<compile_context>
chip_gen: v5e
topology: v5e:2x2
jax: 0.10.0
libtpu: 0.0.40
codegen_flags: <defaults>
</compile_context>

<pallas_src>
import jax
import jax.numpy as jnp
from jax.experimental import pallas as pl
from jax.experimental.pallas import tpu as pltpu


_SMALL_C_MAX = 32             # channel count at/below which the VPU path is used
_VMEM_BUDGET = 20 << 20       # double-buffered streaming budget (< scoped VMEM limit)
_VMEM_LIMIT = 32 << 20        # scoped VMEM limit handed to the compiler
_TARGET_STEP_BYTES = 2 << 20  # aim for ~2 MiB of HBM traffic per grid step
_MIN_GRID_STEPS = 8           # keep both v7x TensorCores fed + >=2-deep pipeline


def _pad8(c):
    """Channels round up to the 8-sublane layout tile (VMEM accounting)."""
    return -(-c // 8) * 8


# ---------------------------------------------------------------------------
# Kernels
# ---------------------------------------------------------------------------
def _make_vpu_kernel(Cg, Cx):
    """Small-channel path: unrolled VPU broadcast-MACs on dense (rows, lanes) slabs."""

    def kernel(x_ref, g_ref, wg_ref, wr_ref, win_ref, b_ref, bin_ref, o_ref):
        # x_ref: (Cx, rows, lanes) VMEM ; g_ref: (Cg, rows, lanes) VMEM
        # wg_ref: (Cg,Cg)  wr_ref: (Cg,Cx)  win_ref/b_ref: (Cg,)  bin_ref: (1,) -- SMEM
        x = x_ref[...].astype(jnp.float32)
        g = g_ref[...].astype(jnp.float32)

        s = None                                        # in_conv accumulator (rows, lanes)
        for co in range(Cg):
            acc = wg_ref[co, 0] * g[0]                  # gate_conv row co (seed, no zero-fill)
            for ci in range(1, Cg):
                acc = acc + wg_ref[co, ci] * g[ci]
            for ci in range(Cx):                        # residual_conv row co
                acc = acc + wr_ref[co, ci] * x[ci]
            acc = jnp.maximum(acc + b_ref[co], 0.0)     # + (bg + br), ReLU
            term = win_ref[co] * acc                    # in_conv (Cg -> 1)
            s = term if s is None else s + term

        # sigmoid(z) = 0.5*tanh(z/2) + 0.5 : tanh runs on the EUP (free slot).
        s = 0.5 * jnp.tanh(0.5 * (s + bin_ref[0])) + 0.5
        o_ref[...] = (s[None] * x).astype(o_ref.dtype)

    return kernel


def _mxu_kernel(x_ref, g_ref, wg_ref, wr_ref, win_ref, b_ref, bin_ref, o_ref):
    """Large-channel path: two MXU dots (no in-kernel concatenate copy)."""
    x = x_ref[...].astype(jnp.float32)                        # (Cx, T)
    g = g_ref[...].astype(jnp.float32)                        # (Cg, T)
    a = (jnp.dot(wg_ref[...], g, preferred_element_type=jnp.float32)
         + jnp.dot(wr_ref[...], x, preferred_element_type=jnp.float32)
         + b_ref[...])                                        # (Cg, T)
    a = jnp.maximum(a, 0.0)
    s = jnp.dot(win_ref[...], a, preferred_element_type=jnp.float32) + bin_ref[...]
    s = 0.5 * jnp.tanh(0.5 * s) + 0.5                         # (1, T)
    o_ref[...] = (s * x).astype(o_ref.dtype)


# ---------------------------------------------------------------------------
# Tile selection
# ---------------------------------------------------------------------------
def _pick_row_tile(rows, lanes, Cx, Cg, batch, itemsize):
    """Rows per grid step for (C, rows, lanes) streaming blocks (VPU path)."""
    # VMEM bytes per row (per buffer): x-in + g-in + x-out, channels padded to
    # the sublane tile, f32-equivalent (conservative for bf16).
    padded_bpr = (2 * _pad8(Cx) + _pad8(Cg)) * lanes * 4
    raw_bpr = max(1, (2 * Cx + Cg) * lanes * itemsize)        # HBM traffic per row
    cands = sorted(set([r for r in range(8, rows + 1, 8)] + [rows]))
    feasible = [r for r in cands if 2 * r * padded_bpr <= _VMEM_BUDGET] or [cands[0]]
    meets = [r for r in feasible if r * raw_bpr >= _TARGET_STEP_BYTES]
    tile = min(meets) if meets else max(feasible)
    # keep enough grid steps for megacore sharding + double-buffering
    while batch * pl.cdiv(rows, tile) < _MIN_GRID_STEPS:
        smaller = [r for r in feasible if r < tile]
        if not smaller:
            break
        tile = max(smaller)
    return tile


def _pick_lane_tile(nsp, Cx, Cg, batch, itemsize):
    """Lane tile for flattened (C, T) streaming blocks (MXU path)."""
    padded_bpp = (2 * _pad8(Cx) + _pad8(Cg)) * 4              # VMEM bytes / pixel (per buffer)
    raw_bpp = max(1, (2 * Cx + Cg) * itemsize)                # HBM bytes / pixel
    cap = max(128, _VMEM_BUDGET // (2 * padded_bpp))
    tile = min(cap, max(_TARGET_STEP_BYTES // raw_bpp, 128), nsp)
    if tile < nsp:
        tile = max(128, (tile // 128) * 128)
        while tile > 128 and batch * pl.cdiv(nsp, tile) < _MIN_GRID_STEPS:
            tile = max(128, ((tile // 2) // 128) * 128)
    return tile


# ---------------------------------------------------------------------------
# Wrapper
# ---------------------------------------------------------------------------
def block_attention_pallas(x_nchw, g_nchw, params):
    """x: (B, Cx, H, W), g: (B, Cg, H, W) -> sigmoid(in_conv(relu(gate+res))) * x."""
    wg, bg, wr, br, win, bin_ = params
    B, Cx, H, W = x_nchw.shape
    Cg = g_nchw.shape[1]
    assert g_nchw.shape == (B, Cg, H, W)
    nsp = H * W
    itemsize = jnp.dtype(x_nchw.dtype).itemsize

    b_comb = (bg + br).astype(jnp.float32)                    # combine biases once (XLA)
    wg32 = wg.astype(jnp.float32)
    wr32 = wr.astype(jnp.float32)
    win32 = win.astype(jnp.float32)
    bin32 = bin_.astype(jnp.float32)

    compiler_params = pltpu.CompilerParams(
        dimension_semantics=("parallel", "parallel"),
        vmem_limit_bytes=_VMEM_LIMIT)

    if Cg <= _SMALL_C_MAX and Cx <= _SMALL_C_MAX:
        # ---------- VPU path: dense (rows, lanes) per-channel slabs ----------
        if nsp % 128 == 0:
            rows, lanes = nsp // 128, 128        # lane-dense, sublane-dense view
        else:
            rows, lanes = H, W                   # tile along H, full W on lanes
        x4 = x_nchw.reshape(B, Cx, rows, lanes)  # free reshape (contiguous trailing dims)
        g4 = g_nchw.reshape(B, Cg, rows, lanes)

        tile_r = _pick_row_tile(rows, lanes, Cx, Cg, B, itemsize)
        grid = (B, pl.cdiv(rows, tile_r))

        def stream_spec(c):
            return pl.BlockSpec((None, c, tile_r, lanes), lambda b, r: (b, 0, r, 0))

        smem = pl.BlockSpec(memory_space=pltpu.MemorySpace.SMEM)

        out4 = pl.pallas_call(
            _make_vpu_kernel(Cg, Cx),
            out_shape=jax.ShapeDtypeStruct((B, Cx, rows, lanes), x_nchw.dtype),
            grid=grid,
            in_specs=[stream_spec(Cx), stream_spec(Cg)] + [smem] * 5,
            out_specs=stream_spec(Cx),
            compiler_params=compiler_params,
        )(x4, g4, wg32, wr32, win32, b_comb, bin32)
        return out4.reshape(B, Cx, H, W)

    # ------------- MXU path: two dots over the channel dimension -------------
    x3 = x_nchw.reshape(B, Cx, nsp)
    g3 = g_nchw.reshape(B, Cg, nsp)
    tile_n = _pick_lane_tile(nsp, Cx, Cg, B, itemsize)
    grid = (B, pl.cdiv(nsp, tile_n))

    def stream_spec3(c):
        return pl.BlockSpec((None, c, tile_n), lambda b, n: (b, 0, n))

    def full_spec(shape):
        return pl.BlockSpec(shape, lambda b, n, _s=shape: tuple(0 for _ in _s))

    out3 = pl.pallas_call(
        _mxu_kernel,
        out_shape=jax.ShapeDtypeStruct((B, Cx, nsp), x_nchw.dtype),
        grid=grid,
        in_specs=[stream_spec3(Cx), stream_spec3(Cg),
                  full_spec((Cg, Cg)), full_spec((Cg, Cx)),
                  full_spec((1, Cg)), full_spec((Cg, 1)), full_spec((1, 1))],
        out_specs=stream_spec3(Cx),
        compiler_params=compiler_params,
    )(x3, g3, wg32, wr32,
      win32.reshape(1, Cg), b_comb.reshape(Cg, 1), bin32.reshape(1, 1))
    return out3.reshape(B, Cx, H, W)


# ---------------------------------------------------------------------------
# Params + pure-JAX reference
# ---------------------------------------------------------------------------
def init_params(key, gate_in_channel, residual_in_channel):
    """Deterministic init matching BlockAttention.__init__ conv shapes.

    Conv2d(C_in, C_out, 1) weight (C_out, C_in, 1, 1) stored as (C_out, C_in).
    """
    ks = jax.random.split(key, 6)
    Cg, Cx = gate_in_channel, residual_in_channel

    def u(k, shape, fan_in):
        bound = 1.0 / jnp.sqrt(fan_in)
        return jax.random.uniform(k, shape, jnp.float32, -bound, bound)

    wg = u(ks[0], (Cg, Cg), Cg)       # gate_conv:     Cg -> Cg
    bg = u(ks[1], (Cg,), Cg)
    wr = u(ks[2], (Cg, Cx), Cx)       # residual_conv: Cx -> Cg
    br = u(ks[3], (Cg,), Cx)
    win = u(ks[4], (Cg,), Cg)         # in_conv:       Cg -> 1
    bin_ = u(ks[5], (1,), Cg)
    return (wg, bg, wr, br, win, bin_)


def block_attention_ref(x, g, params):
    """Pure-JAX reference (same math as the PyTorch forward), NCHW throughout."""
    wg, bg, wr, br, win, bin_ = params
    xf = x.astype(jnp.float32)
    gf = g.astype(jnp.float32)
    a = (jnp.einsum('oc,bchw->bohw', wg, gf) + bg[None, :, None, None]
         + jnp.einsum('oc,bchw->bohw', wr, xf) + br[None, :, None, None])
    a = jnp.maximum(a, 0.0)
    s = jnp.einsum('c,bchw->bhw', win, a)[:, None, :, :] + bin_[0]
    s = jax.nn.sigmoid(s)
    return (s * xf).astype(x.dtype)


if __name__ == "__main__":
    key = jax.random.PRNGKey(0)
    kx, kg, kp = jax.random.split(key, 3)

    B, Cg, Cx, H, W = 2, 4, 4, 16, 16   # gate_in_channel=4, residual_in_channel=4
    x = jax.random.normal(kx, (B, Cx, H, W), jnp.float32)
    g = jax.random.normal(kg, (B, Cg, H, W), jnp.float32)
    params = init_params(kp, Cg, Cx)

    out = jax.block_until_ready(block_attention_pallas(x, g, params))
    ref = block_attention_ref(x, g, params)

    assert out.shape == (B, Cx, H, W)
    assert jnp.allclose(out, ref, atol=1e-5, rtol=1e-5), float(jnp.max(jnp.abs(out - ref)))
    print("KERNEL_OK")
</pallas_src>

<mosaic_0001>
module attributes {stable_mosaic.version = 11 : i64} {
  func.func @kernel(%arg0: i32, %arg1: i32, %arg2: memref<1x4x2x128xf32, #tpu.memory_space<vmem>>, %arg3: memref<1x4x2x128xf32, #tpu.memory_space<vmem>>, %arg4: memref<4x4xf32, #tpu.memory_space<smem>>, %arg5: memref<4x4xf32, #tpu.memory_space<smem>>, %arg6: memref<4xf32, #tpu.memory_space<smem>>, %arg7: memref<4xf32, #tpu.memory_space<smem>>, %arg8: memref<1xf32, #tpu.memory_space<smem>>, %arg9: memref<1x4x2x128xf32, #tpu.memory_space<vmem>>) attributes {dimension_semantics = [#tpu.dimension_semantics<parallel>, #tpu.dimension_semantics<parallel>], iteration_bounds = array<i64: 2, 1>, scalar_prefetch = 0 : i64, scratch_operands = 0 : i64, tpu.core_type = #tpu.core_type<tc>, window_params = [{transform_indices = @transform_0, window_bounds = array<i64: 1, 4, 2, 128>}, {transform_indices = @transform_1, window_bounds = array<i64: 1, 4, 2, 128>}, {transform_indices = @transform_2, window_bounds = array<i64: 4, 4>}, {transform_indices = @transform_3, window_bounds = array<i64: 4, 4>}, {transform_indices = @transform_4, window_bounds = array<i64: 4>}, {transform_indices = @transform_5, window_bounds = array<i64: 4>}, {transform_indices = @transform_6, window_bounds = array<i64: 1>}, {transform_indices = @transform_7, window_bounds = array<i64: 1, 4, 2, 128>}]} {
    %c0 = arith.constant 0 : index
    %c0_0 = arith.constant 0 : index
    %c0_1 = arith.constant 0 : index
    %c0_2 = arith.constant 0 : index
    %0 = vector.load %arg2[%c0, %c0_0, %c0_1, %c0_2] : memref<1x4x2x128xf32, #tpu.memory_space<vmem>>, vector<1x4x2x128xf32>
    %1 = vector.shape_cast %0 : vector<1x4x2x128xf32> to vector<4x2x128xf32>
    %c0_3 = arith.constant 0 : index
    %c0_4 = arith.constant 0 : index
    %c0_5 = arith.constant 0 : index
    %c0_6 = arith.constant 0 : index
    %2 = vector.load %arg3[%c0_3, %c0_4, %c0_5, %c0_6] : memref<1x4x2x128xf32, #tpu.memory_space<vmem>>, vector<1x4x2x128xf32>
    %3 = vector.shape_cast %2 : vector<1x4x2x128xf32> to vector<4x2x128xf32>
    %c0_7 = arith.constant 0 : index
    %c0_8 = arith.constant 0 : index
    %4 = memref.load %arg4[%c0_7, %c0_8] : memref<4x4xf32, #tpu.memory_space<smem>>
    %5 = vector.extract_strided_slice %3 {offsets = [0, 0, 0], sizes = [1, 2, 128], strides = [1, 1, 1]} : vector<4x2x128xf32> to vector<1x2x128xf32>
    %6 = vector.shape_cast %5 : vector<1x2x128xf32> to vector<2x128xf32>
    %7 = vector.broadcast %4 : f32 to vector<2x128xf32>
    %8 = arith.mulf %7, %6 : vector<2x128xf32>
    %c0_9 = arith.constant 0 : index
    %c1 = arith.constant 1 : index
    %9 = memref.load %arg4[%c0_9, %c1] : memref<4x4xf32, #tpu.memory_space<smem>>
    %10 = vector.extract_strided_slice %3 {offsets = [1, 0, 0], sizes = [1, 2, 128], strides = [1, 1, 1]} : vector<4x2x128xf32> to vector<1x2x128xf32>
    %11 = vector.shape_cast %10 : vector<1x2x128xf32> to vector<2x128xf32>
    %12 = vector.broadcast %9 : f32 to vector<2x128xf32>
    %13 = arith.mulf %12, %11 : vector<2x128xf32>
    %14 = arith.addf %8, %13 : vector<2x128xf32>
    %c0_10 = arith.constant 0 : index
    %c2 = arith.constant 2 : index
    %15 = memref.load %arg4[%c0_10, %c2] : memref<4x4xf32, #tpu.memory_space<smem>>
    %16 = vector.extract_strided_slice %3 {offsets = [2, 0, 0], sizes = [1, 2, 128], strides = [1, 1, 1]} : vector<4x2x128xf32> to vector<1x2x128xf32>
    %17 = vector.shape_cast %16 : vector<1x2x128xf32> to vector<2x128xf32>
    %18 = vector.broadcast %15 : f32 to vector<2x128xf32>
    %19 = arith.mulf %18, %17 : vector<2x128xf32>
    %20 = arith.addf %14, %19 : vector<2x128xf32>
    %c0_11 = arith.constant 0 : index
    %c3 = arith.constant 3 : index
    %21 = memref.load %arg4[%c0_11, %c3] : memref<4x4xf32, #tpu.memory_space<smem>>
    %22 = vector.extract_strided_slice %3 {offsets = [3, 0, 0], sizes = [1, 2, 128], strides = [1, 1, 1]} : vector<4x2x128xf32> to vector<1x2x128xf32>
    %23 = vector.shape_cast %22 : vector<1x2x128xf32> to vector<2x128xf32>
    %24 = vector.broadcast %21 : f32 to vector<2x128xf32>
    %25 = arith.mulf %24, %23 : vector<2x128xf32>
    %26 = arith.addf %20, %25 : vector<2x128xf32>
    %c0_12 = arith.constant 0 : index
    %c0_13 = arith.constant 0 : index
    %27 = memref.load %arg5[%c0_12, %c0_13] : memref<4x4xf32, #tpu.memory_space<smem>>
    %28 = vector.extract_strided_slice %1 {offsets = [0, 0, 0], sizes = [1, 2, 128], strides = [1, 1, 1]} : vector<4x2x128xf32> to vector<1x2x128xf32>
    %29 = vector.shape_cast %28 : vector<1x2x128xf32> to vector<2x128xf32>
    %30 = vector.broadcast %27 : f32 to vector<2x128xf32>
    %31 = arith.mulf %30, %29 : vector<2x128xf32>
    %32 = arith.addf %26, %31 : vector<2x128xf32>
    %c0_14 = arith.constant 0 : index
    %c1_15 = arith.constant 1 : index
    %33 = memref.load %arg5[%c0_14, %c1_15] : memref<4x4xf32, #tpu.memory_space<smem>>
    %34 = vector.extract_strided_slice %1 {offsets = [1, 0, 0], sizes = [1, 2, 128], strides = [1, 1, 1]} : vector<4x2x128xf32> to vector<1x2x128xf32>
    %35 = vector.shape_cast %34 : vector<1x2x128xf32> to vector<2x128xf32>
    %36 = vector.broadcast %33 : f32 to vector<2x128xf32>
    %37 = arith.mulf %36, %35 : vector<2x128xf32>
    %38 = arith.addf %32, %37 : vector<2x128xf32>
    %c0_16 = arith.constant 0 : index
    %c2_17 = arith.constant 2 : index
    %39 = memref.load %arg5[%c0_16, %c2_17] : memref<4x4xf32, #tpu.memory_space<smem>>
    %40 = vector.extract_strided_slice %1 {offsets = [2, 0, 0], sizes = [1, 2, 128], strides = [1, 1, 1]} : vector<4x2x128xf32> to vector<1x2x128xf32>
    %41 = vector.shape_cast %40 : vector<1x2x128xf32> to vector<2x128xf32>
    %42 = vector.broadcast %39 : f32 to vector<2x128xf32>
    %43 = arith.mulf %42, %41 : vector<2x128xf32>
    %44 = arith.addf %38, %43 : vector<2x128xf32>
    %c0_18 = arith.constant 0 : index
    %c3_19 = arith.constant 3 : index
    %45 = memref.load %arg5[%c0_18, %c3_19] : memref<4x4xf32, #tpu.memory_space<smem>>
    %46 = vector.extract_strided_slice %1 {offsets = [3, 0, 0], sizes = [1, 2, 128], strides = [1, 1, 1]} : vector<4x2x128xf32> to vector<1x2x128xf32>
    %47 = vector.shape_cast %46 : vector<1x2x128xf32> to vector<2x128xf32>
    %48 = vector.broadcast %45 : f32 to vector<2x128xf32>
    %49 = arith.mulf %48, %47 : vector<2x128xf32>
    %50 = arith.addf %44, %49 : vector<2x128xf32>
    %c0_20 = arith.constant 0 : index
    %51 = memref.load %arg7[%c0_20] : memref<4xf32, #tpu.memory_space<smem>>
    %52 = vector.broadcast %51 : f32 to vector<2x128xf32>
    %53 = arith.addf %50, %52 : vector<2x128xf32>
    %cst = arith.constant 0.000000e+00 : f32
    %54 = vector.broadcast %cst : f32 to vector<2x128xf32>
    %55 = arith.maximumf %53, %54 : vector<2x128xf32>
    %c0_21 = arith.constant 0 : index
    %56 = memref.load %arg6[%c0_21] : memref<4xf32, #tpu.memory_space<smem>>
    %57 = vector.broadcast %56 : f32 to vector<2x128xf32>
    %58 = arith.mulf %57, %55 : vector<2x128xf32>
    %c1_22 = arith.constant 1 : index
    %c0_23 = arith.constant 0 : index
    %59 = memref.load %arg4[%c1_22, %c0_23] : memref<4x4xf32, #tpu.memory_space<smem>>
    %60 = vector.extract_strided_slice %3 {offsets = [0, 0, 0], sizes = [1, 2, 128], strides = [1, 1, 1]} : vector<4x2x128xf32> to vector<1x2x128xf32>
    %61 = vector.shape_cast %60 : vector<1x2x128xf32> to vector<2x128xf32>
    %62 = vector.broadcast %59 : f32 to vector<2x128xf32>
    %63 = arith.mulf %62, %61 : vector<2x128xf32>
    %c1_24 = arith.constant 1 : index
    %c1_25 = arith.constant 1 : index
    %64 = memref.load %arg4[%c1_24, %c1_25] : memref<4x4xf32, #tpu.memory_space<smem>>
    %65 = vector.extract_strided_slice %3 {offsets = [1, 0, 0], sizes = [1, 2, 128], strides = [1, 1, 1]} : vector<4x2x128xf32> to vector<1x2x128xf32>
    %66 = vector.shape_cast %65 : vector<1x2x128xf32> to vector<2x128xf32>
    %67 = vector.broadcast %64 : f32 to vector<2x128xf32>
    %68 = arith.mulf %67, %66 : vector<2x128xf32>
    %69 = arith.addf %63, %68 : vector<2x128xf32>
    %c1_26 = arith.constant 1 : index
    %c2_27 = arith.constant 2 : index
    %70 = memref.load %arg4[%c1_26, %c2_27] : memref<4x4xf32, #tpu.memory_space<smem>>
    %71 = vector.extract_strided_slice %3 {offsets = [2, 0, 0], sizes = [1, 2, 128], strides = [1, 1, 1]} : vector<4x2x128xf32> to vector<1x2x128xf32>
    %72 = vector.shape_cast %71 : vector<1x2x128xf32> to vector<2x128xf32>
    %73 = vector.broadcast %70 : f32 to vector<2x128xf32>
    %74 = arith.mulf %73, %72 : vector<2x128xf32>
    %75 = arith.addf %69, %74 : vector<2x128xf32>
    %c1_28 = arith.constant 1 : index
    %c3_29 = arith.constant 3 : index
    %76 = memref.load %arg4[%c1_28, %c3_29] : memref<4x4xf32, #tpu.memory_space<smem>>
    %77 = vector.extract_strided_slice %3 {offsets = [3, 0, 0], sizes = [1, 2, 128], strides = [1, 1, 1]} : vector<4x2x128xf32> to vector<1x2x128xf32>
    %78 = vector.shape_cast %77 : vector<1x2x128xf32> to vector<2x128xf32>
    %79 = vector.broadcast %76 : f32 to vector<2x128xf32>
    %80 = arith.mulf %79, %78 : vector<2x128xf32>
    %81 = arith.addf %75, %80 : vector<2x128xf32>
    %c1_30 = arith.constant 1 : index
    %c0_31 = arith.constant 0 : index
    %82 = memref.load %arg5[%c1_30, %c0_31] : memref<4x4xf32, #tpu.memory_space<smem>>
    %83 = vector.extract_strided_slice %1 {offsets = [0, 0, 0], sizes = [1, 2, 128], strides = [1, 1, 1]} : vector<4x2x128xf32> to vector<1x2x128xf32>
    %84 = vector.shape_cast %83 : vector<1x2x128xf32> to vector<2x128xf32>
    %85 = vector.broadcast %82 : f32 to vector<2x128xf32>
    %86 = arith.mulf %85, %84 : vector<2x128xf32>
    %87 = arith.addf %81, %86 : vector<2x128xf32>
    %c1_32 = arith.constant 1 : index
    %c1_33 = arith.constant 1 : index
    %88 = memref.load %arg5[%c1_32, %c1_33] : memref<4x4xf32, #tpu.memory_space<smem>>
    %89 = vector.extract_strided_slice %1 {offsets = [1, 0, 0], sizes = [1, 2, 128], strides = [1, 1, 1]} : vector<4x2x128xf32> to vector<1x2x128xf32>
    %90 = vector.shape_cast %89 : vector<1x2x128xf32> to vector<2x128xf32>
    %91 = vector.broadcast %88 : f32 to vector<2x128xf32>
    %92 = arith.mulf %91, %90 : vector<2x128xf32>
    %93 = arith.addf %87, %92 : vector<2x128xf32>
    %c1_34 = arith.constant 1 : index
    %c2_35 = arith.constant 2 : index
    %94 = memref.load %arg5[%c1_34, %c2_35] : memref<4x4xf32, #tpu.memory_space<smem>>
    %95 = vector.extract_strided_slice %1 {offsets = [2, 0, 0], sizes = [1, 2, 128], strides = [1, 1, 1]} : vector<4x2x128xf32> to vector<1x2x128xf32>
    %96 = vector.shape_cast %95 : vector<1x2x128xf32> to vector<2x128xf32>
    %97 = vector.broadcast %94 : f32 to vector<2x128xf32>
    %98 = arith.mulf %97, %96 : vector<2x128xf32>
    %99 = arith.addf %93, %98 : vector<2x128xf32>
    %c1_36 = arith.constant 1 : index
    %c3_37 = arith.constant 3 : index
    %100 = memref.load %arg5[%c1_36, %c3_37] : memref<4x4xf32, #tpu.memory_space<smem>>
    %101 = vector.extract_strided_slice %1 {offsets = [3, 0, 0], sizes = [1, 2, 128], strides = [1, 1, 1]} : vector<4x2x128xf32> to vector<1x2x128xf32>
    %102 = vector.shape_cast %101 : vector<1x2x128xf32> to vector<2x128xf32>
    %103 = vector.broadcast %100 : f32 to vector<2x128xf32>
    %104 = arith.mulf %103, %102 : vector<2x128xf32>
    %105 = arith.addf %99, %104 : vector<2x128xf32>
    %c1_38 = arith.constant 1 : index
    %106 = memref.load %arg7[%c1_38] : memref<4xf32, #tpu.memory_space<smem>>
    %107 = vector.broadcast %106 : f32 to vector<2x128xf32>
    %108 = arith.addf %105, %107 : vector<2x128xf32>
    %cst_39 = arith.constant 0.000000e+00 : f32
    %109 = vector.broadcast %cst_39 : f32 to vector<2x128xf32>
    %110 = arith.maximumf %108, %109 : vector<2x128xf32>
    %c1_40 = arith.constant 1 : index
    %111 = memref.load %arg6[%c1_40] : memref<4xf32, #tpu.memory_space<smem>>
    %112 = vector.broadcast %111 : f32 to vector<2x128xf32>
    %113 = arith.mulf %112, %110 : vector<2x128xf32>
    %114 = arith.addf %58, %113 : vector<2x128xf32>
    %c2_41 = arith.constant 2 : index
    %c0_42 = arith.constant 0 : index
    %115 = memref.load %arg4[%c2_41, %c0_42] : memref<4x4xf32, #tpu.memory_space<smem>>
    %116 = vector.extract_strided_slice %3 {offsets = [0, 0, 0], sizes = [1, 2, 128], strides = [1, 1, 1]} : vector<4x2x128xf32> to vector<1x2x128xf32>
    %117 = vector.shape_cast %116 : vector<1x2x128xf32> to vector<2x128xf32>
    %118 = vector.broadcast %115 : f32 to vector<2x128xf32>
    %119 = arith.mulf %118, %117 : vector<2x128xf32>
    %c2_43 = arith.constant 2 : index
    %c1_44 = arith.constant 1 : index
    %120 = memref.load %arg4[%c2_43, %c1_44] : memref<4x4xf32, #tpu.memory_space<smem>>
    %121 = vector.extract_strided_slice %3 {offsets = [1, 0, 0], sizes = [1, 2, 128], strides = [1, 1, 1]} : vector<4x2x128xf32> to vector<1x2x128xf32>
    %122 = vector.shape_cast %121 : vector<1x2x128xf32> to vector<2x128xf32>
    %123 = vector.broadcast %120 : f32 to vector<2x128xf32>
    %124 = arith.mulf %123, %122 : vector<2x128xf32>
    %125 = arith.addf %119, %124 : vector<2x128xf32>
    %c2_45 = arith.constant 2 : index
    %c2_46 = arith.constant 2 : index
    %126 = memref.load %arg4[%c2_45, %c2_46] : memref<4x4xf32, #tpu.memory_space<smem>>
    %127 = vector.extract_strided_slice %3 {offsets = [2, 0, 0], sizes = [1, 2, 128], strides = [1, 1, 1]} : vector<4x2x128xf32> to vector<1x2x128xf32>
    %128 = vector.shape_cast %127 : vector<1x2x128xf32> to vector<2x128xf32>
    %129 = vector.broadcast %126 : f32 to vector<2x128xf32>
    %130 = arith.mulf %129, %128 : vector<2x128xf32>
    %131 = arith.addf %125, %130 : vector<2x128xf32>
    %c2_47 = arith.constant 2 : index
    %c3_48 = arith.constant 3 : index
    %132 = memref.load %arg4[%c2_47, %c3_48] : memref<4x4xf32, #tpu.memory_space<smem>>
    %133 = vector.extract_strided_slice %3 {offsets = [3, 0, 0], sizes = [1, 2, 128], strides = [1, 1, 1]} : vector<4x2x128xf32> to vector<1x2x128xf32>
    %134 = vector.shape_cast %133 : vector<1x2x128xf32> to vector<2x128xf32>
    %135 = vector.broadcast %132 : f32 to vector<2x128xf32>
    %136 = arith.mulf %135, %134 : vector<2x128xf32>
    %137 = arith.addf %131, %136 : vector<2x128xf32>
    %c2_49 = arith.constant 2 : index
    %c0_50 = arith.constant 0 : index
    %138 = memref.load %arg5[%c2_49, %c0_50] : memref<4x4xf32, #tpu.memory_space<smem>>
    %139 = vector.extract_strided_slice %1 {offsets = [0, 0, 0], sizes = [1, 2, 128], strides = [1, 1, 1]} : vector<4x2x128xf32> to vector<1x2x128xf32>
    %140 = vector.shape_cast %139 : vector<1x2x128xf32> to vector<2x128xf32>
    %141 = vector.broadcast %138 : f32 to vector<2x128xf32>
    %142 = arith.mulf %141, %140 : vector<2x128xf32>
    %143 = arith.addf %137, %142 : vector<2x128xf32>
    %c2_51 = arith.constant 2 : index
    %c1_52 = arith.constant 1 : index
    %144 = memref.load %arg5[%c2_51, %c1_52] : memref<4x4xf32, #tpu.memory_space<smem>>
    %145 = vector.extract_strided_slice %1 {offsets = [1, 0, 0], sizes = [1, 2, 128], strides = [1, 1, 1]} : vector<4x2x128xf32> to vector<1x2x128xf32>
    %146 = vector.shape_cast %145 : vector<1x2x128xf32> to vector<2x128xf32>
    %147 = vector.broadcast %144 : f32 to vector<2x128xf32>
    %148 = arith.mulf %147, %146 : vector<2x128xf32>
    %149 = arith.addf %143, %148 : vector<2x128xf32>
    %c2_53 = arith.constant 2 : index
    %c2_54 = arith.constant 2 : index
    %150 = memref.load %arg5[%c2_53, %c2_54] : memref<4x4xf32, #tpu.memory_space<smem>>
    %151 = vector.extract_strided_slice %1 {offsets = [2, 0, 0], sizes = [1, 2, 128], strides = [1, 1, 1]} : vector<4x2x128xf32> to vector<1x2x128xf32>
    %152 = vector.shape_cast %151 : vector<1x2x128xf32> to vector<2x128xf32>
    %153 = vector.broadcast %150 : f32 to vector<2x128xf32>
    %154 = arith.mulf %153, %152 : vector<2x128xf32>
    %155 = arith.addf %149, %154 : vector<2x128xf32>
    %c2_55 = arith.constant 2 : index
    %c3_56 = arith.constant 3 : index
    %156 = memref.load %arg5[%c2_55, %c3_56] : memref<4x4xf32, #tpu.memory_space<smem>>
    %157 = vector.extract_strided_slice %1 {offsets = [3, 0, 0], sizes = [1, 2, 128], strides = [1, 1, 1]} : vector<4x2x128xf32> to vector<1x2x128xf32>
    %158 = vector.shape_cast %157 : vector<1x2x128xf32> to vector<2x128xf32>
    %159 = vector.broadcast %156 : f32 to vector<2x128xf32>
    %160 = arith.mulf %159, %158 : vector<2x128xf32>
    %161 = arith.addf %155, %160 : vector<2x128xf32>
    %c2_57 = arith.constant 2 : index
    %162 = memref.load %arg7[%c2_57] : memref<4xf32, #tpu.memory_space<smem>>
    %163 = vector.broadcast %162 : f32 to vector<2x128xf32>
    %164 = arith.addf %161, %163 : vector<2x128xf32>
    %cst_58 = arith.constant 0.000000e+00 : f32
    %165 = vector.broadcast %cst_58 : f32 to vector<2x128xf32>
    %166 = arith.maximumf %164, %165 : vector<2x128xf32>
    %c2_59 = arith.constant 2 : index
    %167 = memref.load %arg6[%c2_59] : memref<4xf32, #tpu.memory_space<smem>>
    %168 = vector.broadcast %167 : f32 to vector<2x128xf32>
    %169 = arith.mulf %168, %166 : vector<2x128xf32>
    %170 = arith.addf %114, %169 : vector<2x128xf32>
    %c3_60 = arith.constant 3 : index
    %c0_61 = arith.constant 0 : index
    %171 = memref.load %arg4[%c3_60, %c0_61] : memref<4x4xf32, #tpu.memory_space<smem>>
    %172 = vector.extract_strided_slice %3 {offsets = [0, 0, 0], sizes = [1, 2, 128], strides = [1, 1, 1]} : vector<4x2x128xf32> to vector<1x2x128xf32>
    %173 = vector.shape_cast %172 : vector<1x2x128xf32> to vector<2x128xf32>
    %174 = vector.broadcast %171 : f32 to vector<2x128xf32>
    %175 = arith.mulf %174, %173 : vector<2x128xf32>
    %c3_62 = arith.constant 3 : index
    %c1_63 = arith.constant 1 : index
    %176 = memref.load %arg4[%c3_62, %c1_63] : memref<4x4xf32, #tpu.memory_space<smem>>
    %177 = vector.extract_strided_slice %3 {offsets = [1, 0, 0], sizes = [1, 2, 128], strides = [1, 1, 1]} : vector<4x2x128xf32> to vector<1x2x128xf32>
    %178 = vector.shape_cast %177 : vector<1x2x128xf32> to vector<2x128xf32>
    %179 = vector.broadcast %176 : f32 to vector<2x128xf32>
    %180 = arith.mulf %179, %178 : vector<2x128xf32>
    %181 = arith.addf %175, %180 : vector<2x128xf32>
    %c3_64 = arith.constant 3 : index
    %c2_65 = arith.constant 2 : index
    %182 = memref.load %arg4[%c3_64, %c2_65] : memref<4x4xf32, #tpu.memory_space<smem>>
    %183 = vector.extract_strided_slice %3 {offsets = [2, 0, 0], sizes = [1, 2, 128], strides = [1, 1, 1]} : vector<4x2x128xf32> to vector<1x2x128xf32>
    %184 = vector.shape_cast %183 : vector<1x2x128xf32> to vector<2x128xf32>
    %185 = vector.broadcast %182 : f32 to vector<2x128xf32>
    %186 = arith.mulf %185, %184 : vector<2x128xf32>
    %187 = arith.addf %181, %186 : vector<2x128xf32>
    %c3_66 = arith.constant 3 : index
    %c3_67 = arith.constant 3 : index
    %188 = memref.load %arg4[%c3_66, %c3_67] : memref<4x4xf32, #tpu.memory_space<smem>>
    %189 = vector.extract_strided_slice %3 {offsets = [3, 0, 0], sizes = [1, 2, 128], strides = [1, 1, 1]} : vector<4x2x128xf32> to vector<1x2x128xf32>
    %190 = vector.shape_cast %189 : vector<1x2x128xf32> to vector<2x128xf32>
    %191 = vector.broadcast %188 : f32 to vector<2x128xf32>
    %192 = arith.mulf %191, %190 : vector<2x128xf32>
    %193 = arith.addf %187, %192 : vector<2x128xf32>
    %c3_68 = arith.constant 3 : index
    %c0_69 = arith.constant 0 : index
    %194 = memref.load %arg5[%c3_68, %c0_69] : memref<4x4xf32, #tpu.memory_space<smem>>
    %195 = vector.extract_strided_slice %1 {offsets = [0, 0, 0], sizes = [1, 2, 128], strides = [1, 1, 1]} : vector<4x2x128xf32> to vector<1x2x128xf32>
    %196 = vector.shape_cast %195 : vector<1x2x128xf32> to vector<2x128xf32>
    %197 = vector.broadcast %194 : f32 to vector<2x128xf32>
    %198 = arith.mulf %197, %196 : vector<2x128xf32>
    %199 = arith.addf %193, %198 : vector<2x128xf32>
    %c3_70 = arith.constant 3 : index
    %c1_71 = arith.constant 1 : index
    %200 = memref.load %arg5[%c3_70, %c1_71] : memref<4x4xf32, #tpu.memory_space<smem>>
    %201 = vector.extract_strided_slice %1 {offsets = [1, 0, 0], sizes = [1, 2, 128], strides = [1, 1, 1]} : vector<4x2x128xf32> to vector<1x2x128xf32>
    %202 = vector.shape_cast %201 : vector<1x2x128xf32> to vector<2x128xf32>
    %203 = vector.broadcast %200 : f32 to vector<2x128xf32>
    %204 = arith.mulf %203, %202 : vector<2x128xf32>
    %205 = arith.addf %199, %204 : vector<2x128xf32>
    %c3_72 = arith.constant 3 : index
    %c2_73 = arith.constant 2 : index
    %206 = memref.load %arg5[%c3_72, %c2_73] : memref<4x4xf32, #tpu.memory_space<smem>>
    %207 = vector.extract_strided_slice %1 {offsets = [2, 0, 0], sizes = [1, 2, 128], strides = [1, 1, 1]} : vector<4x2x128xf32> to vector<1x2x128xf32>
    %208 = vector.shape_cast %207 : vector<1x2x128xf32> to vector<2x128xf32>
    %209 = vector.broadcast %206 : f32 to vector<2x128xf32>
    %210 = arith.mulf %209, %208 : vector<2x128xf32>
    %211 = arith.addf %205, %210 : vector<2x128xf32>
    %c3_74 = arith.constant 3 : index
    %c3_75 = arith.constant 3 : index
    %212 = memref.load %arg5[%c3_74, %c3_75] : memref<4x4xf32, #tpu.memory_space<smem>>
    %213 = vector.extract_strided_slice %1 {offsets = [3, 0, 0], sizes = [1, 2, 128], strides = [1, 1, 1]} : vector<4x2x128xf32> to vector<1x2x128xf32>
    %214 = vector.shape_cast %213 : vector<1x2x128xf32> to vector<2x128xf32>
    %215 = vector.broadcast %212 : f32 to vector<2x128xf32>
    %216 = arith.mulf %215, %214 : vector<2x128xf32>
    %217 = arith.addf %211, %216 : vector<2x128xf32>
    %c3_76 = arith.constant 3 : index
    %218 = memref.load %arg7[%c3_76] : memref<4xf32, #tpu.memory_space<smem>>
    %219 = vector.broadcast %218 : f32 to vector<2x128xf32>
    %220 = arith.addf %217, %219 : vector<2x128xf32>
    %cst_77 = arith.constant 0.000000e+00 : f32
    %221 = vector.broadcast %cst_77 : f32 to vector<2x128xf32>
    %222 = arith.maximumf %220, %221 : vector<2x128xf32>
    %c3_78 = arith.constant 3 : index
    %223 = memref.load %arg6[%c3_78] : memref<4xf32, #tpu.memory_space<smem>>
    %224 = vector.broadcast %223 : f32 to vector<2x128xf32>
    %225 = arith.mulf %224, %222 : vector<2x128xf32>
    %226 = arith.addf %170, %225 : vector<2x128xf32>
    %c0_79 = arith.constant 0 : index
    %227 = memref.load %arg8[%c0_79] : memref<1xf32, #tpu.memory_space<smem>>
    %228 = vector.broadcast %227 : f32 to vector<2x128xf32>
    %229 = arith.addf %226, %228 : vector<2x128xf32>
    %cst_80 = arith.constant 5.000000e-01 : f32
    %230 = vector.broadcast %cst_80 : f32 to vector<2x128xf32>
    %231 = arith.mulf %230, %229 : vector<2x128xf32>
    %232 = math.tanh %231 : vector<2x128xf32>
    %cst_81 = arith.constant 5.000000e-01 : f32
    %233 = vector.broadcast %cst_81 : f32 to vector<2x128xf32>
    %234 = arith.mulf %233, %232 : vector<2x128xf32>
    %cst_82 = arith.constant 5.000000e-01 : f32
    %235 = vector.broadcast %cst_82 : f32 to vector<2x128xf32>
    %236 = arith.addf %234, %235 : vector<2x128xf32>
    %237 = vector.shape_cast %236 : vector<2x128xf32> to vector<1x2x128xf32>
    %238 = vector.broadcast %237 : vector<1x2x128xf32> to vector<4x2x128xf32>
    %239 = arith.mulf %238, %1 : vector<4x2x128xf32>
    %c0_83 = arith.constant 0 : index
    %c0_84 = arith.constant 0 : index
    %c0_85 = arith.constant 0 : index
    %c0_86 = arith.constant 0 : index
    %240 = vector.load %arg9[%c0_83, %c0_84, %c0_85, %c0_86] : memref<1x4x2x128xf32, #tpu.memory_space<vmem>>, vector<1x4x2x128xf32>
    %241 = vector.shape_cast %240 : vector<1x4x2x128xf32> to vector<4x2x128xf32>
    %242 = vector.shape_cast %239 : vector<4x2x128xf32> to vector<1x4x2x128xf32>
    tpu.vector_store %arg9[%c0_83, %c0_84, %c0_85, %c0_86], %242 {strides = array<i32>} : memref<1x4x2x128xf32, #tpu.memory_space<vmem>>, vector<1x4x2x128xf32>,
    return
  }
  func.func @transform_0(%arg0: i32, %arg1: i32) -> (i32, i32, i32, i32) {
    %c0_i32 = arith.constant 0 : i32
    %c0_i32_0 = arith.constant 0 : i32
    %c0_i32_1 = arith.constant 0 : i32
    return %arg0, %c0_i32, %arg1, %c0_i32_0 : i32, i32, i32, i32
  }
  func.func @transform_1(%arg0: i32, %arg1: i32) -> (i32, i32, i32, i32) {
    %c0_i32 = arith.constant 0 : i32
    %c0_i32_0 = arith.constant 0 : i32
    %c0_i32_1 = arith.constant 0 : i32
    return %arg0, %c0_i32, %arg1, %c0_i32_0 : i32, i32, i32, i32
  }
  func.func @transform_2(%arg0: i32, %arg1: i32) -> (i32, i32) {
    %c0_i32 = arith.constant 0 : i32
    %c0_i32_0 = arith.constant 0 : i32
    %c0_i32_1 = arith.constant 0 : i32
    return %c0_i32, %c0_i32_0 : i32, i32
  }
  func.func @transform_3(%arg0: i32, %arg1: i32) -> (i32, i32) {
    %c0_i32 = arith.constant 0 : i32
    %c0_i32_0 = arith.constant 0 : i32
    %c0_i32_1 = arith.constant 0 : i32
    return %c0_i32, %c0_i32_0 : i32, i32
  }
  func.func @transform_4(%arg0: i32, %arg1: i32) -> i32 {
    %c0_i32 = arith.constant 0 : i32
    %c0_i32_0 = arith.constant 0 : i32
    return %c0_i32 : i32
  }
  func.func @transform_5(%arg0: i32, %arg1: i32) -> i32 {
    %c0_i32 = arith.constant 0 : i32
    %c0_i32_0 = arith.constant 0 : i32
    return %c0_i32 : i32
  }
  func.func @transform_6(%arg0: i32, %arg1: i32) -> i32 {
    %c0_i32 = arith.constant 0 : i32
    %c0_i32_0 = arith.constant 0 : i32
    return %c0_i32 : i32
  }
  func.func @transform_7(%arg0: i32, %arg1: i32) -> (i32, i32, i32, i32) {
    %c0_i32 = arith.constant 0 : i32
    %c0_i32_0 = arith.constant 0 : i32
    %c0_i32_1 = arith.constant 0 : i32
    return %arg0, %c0_i32, %arg1, %c0_i32_0 : i32, i32, i32, i32
  }
}

</mosaic_0001>

<bundles_post_ra>
// kernel: tpu_custom_call.1
= control target key start
LH: loop header
LB: loop body
LE: loop exit
PB: predicated region body
PF: predicated region fallthrough
CT: control target
= control target key end

     0   :  { %s1518_s0 = inlined_call_operand.hbm [shape: f32[2,4,2,128], index: 0, kind: input, shape index: {}]   ;;  %s1519_s1 = inlined_call_operand.hbm [shape: f32[2,4,2,128], index: 1, kind: input, shape index: {}]   ;;  %s1520_s2 = inlined_call_operand.hbm [shape: f32[4,4], index: 2, kind: input, shape index: {}]   ;;  %s1521_s3 = inlined_call_operand.vmem [shape: f32[4,4], index: 3, kind: input, shape index: {}]   ;;  %s1522_s4 = inlined_call_operand.vmem [shape: f32[4], index: 4, kind: input, shape index: {}]   ;;  %s1523_s5 = inlined_call_operand.vmem [shape: f32[4], index: 5, kind: input, shape index: {}]   ;;  %s1524_s6 = inlined_call_operand.<no memory space> [shape: f32[1], index: 6, kind: input, shape index: {}]   ;;  %s1525_s7 = inlined_call_operand.hbm [shape: f32[2,4,2,128], index: 7, kind: output, shape index: {}]  }
   0x1   :  { %1528 = sst [smem:[#allocation25_spill]] %s1520_s2 }
   0x2   :  { %1529 = sst [smem:[#allocation26_spill]] %s1521_s3 }
   0x3   :  { %1530 = sst [smem:[#allocation27_spill]] %s1522_s4 }
   0x4   :  { %1531 = sst [smem:[#allocation28_spill]] %s1523_s5 }
   0x5   :  { %12 = sst [smem:[#allocation2]] %s1524_s6 }
   0x6   :  { %13 = vsyncpa [#allocation4], 0 }
   0x7   :  { %15 = vsyncpa [#allocation4 + $0x1], 0 }
   0x8   :  { %16 = vsyncpa [#allocation9], 0 }
   0x9   :  { %18 = vsyncpa [#allocation9 + $0x1], 0 }
   0xa   :  { %19 = vsyncpa [#allocation6], 0 }
   0xb   :  { %20 = vsyncpa [#allocation7], 0 }
   0xc   :  { %21 = vsyncpa [#allocation13], 0 }
   0xd   :  { %22 = vsyncpa [#allocation5], 0 }
   0xe   :  { %24 = vsyncpa [#allocation5 + $0x1], 0  ;;  %s1213_s26 = smov 0   ;;  %s1215_s27 = smov 0  }
   0xf   :  { %s1217_s28 = smov 0   ;;  %s1219_s29 = smov 0  }
  0x10   :  { %s1221_s30 = smov 0   ;;  %s1223_s6 = smov 0  }
  0x11 LB: > { %1532 = sst [smem:[#allocation22_spill]] %s1156_s30  ;;  %s762_s8 = sadd.s32 4294967295, %s1160_s6   ;;  %s1160_s6 = sphi %s1223_s6, %s30_s6   ;;  %s1156_s30 = sphi %s1221_s30, %s1552_s30   ;;  %s1152_s29 = sphi %s1219_s29, %s1547_s29   ;;  %s1148_s28 = sphi %s1217_s28, %s1551_s28   ;;  %s1144_s27 = sphi %s1215_s27, %s1550_s27   ;;  %s1140_s26 = sphi %s1213_s26, %s1549_s26  }
  0x12   : > { %s763_s9 = sadd.s32 4294967294, %s1160_s6   ;;  %p64_p0 = scmp.ne.s32.totalorder %s1144_s27, %s1140_s26 }
  0x13   : > { %p1247_p1 = scmp.eq.s32.totalorder %s762_s8, 0  ;;  %p1251_p2 = scmp.eq.s32.totalorder %s762_s8, 1 }
  0x14   : > { %p229_p3 = scmp.eq.s32.totalorder %s763_s9, 1  ;;  %p764_p5 = scmp.ge.s32.totalorder %s1160_s6, 1 }
  0x15   : > { %p1257_p4 = por %p1247_p1, %p64_p0  ;;  %p236_p7 = scmp.lt.s32.totalorder %s1160_s6, 3 }
  0x16   : > { %p1262_p6 = por %p229_p3, %p64_p0  ;;  %s1537_s4 = sld [smem:[#allocation27_spill]] }
  0x17   : > { %p1270_p8 = pnand %p764_p5, %p236_p7  ;;  %p769_p9 = scmp.ge.s32.totalorder %s1160_s6, 2 }
  0x18   : > { %s1539_s2 = sld [smem:[#allocation25_spill]]  ;;  %s1162_s24 = smov [#allocation12]  }
  0x19   : > { %p850_p10 = pneg %p1270_p8  ;;  %s1540_s3 = sld [smem:[#allocation26_spill]] }
  0x1a   : > { %s1163_s25 = smov [#allocation10]   ;;  %s1541_s5 = sld [smem:[#allocation28_spill]] }
  0x1b   : > { %p851_p11 = pnand %p850_p10, %p1247_p1  ;;  %s1164_s15 = smov [#allocation11]  }
  0x1c   : > { %s268_s16 = sshll.u32 %s1537_s4, 4  ;;  %s1165_s18 = smov [#allocation14]   ;;  %s269_s16 = int_to_ptr.vmem [resolvable:$true] %s268_s16 }
  0x1d   : > { %859 = dma.vmem_to_smem (!%p851_p11), %s269_s16, 16, %s1162_s24, [#allocation13]  }
  0x1e   : > { %s248_s20 = sshll.u32 %s1539_s2, 4  ;;  %s42_s19 = sadd.s32 1, %s1156_s30  ;;  %s249_s20 = int_to_ptr.hbm [resolvable:$true] %s248_s20 }
  0x1f   : > { %s258_s23 = sshll.u32 %s1540_s3, 4  ;;  %s51_s21 = sadd.s32 1, %s1148_s28  ;;  %s259_s23 = int_to_ptr.vmem [resolvable:$true] %s258_s23 }
  0x20   : > { %853 = dma.hbm_to_smem (!%p851_p11), %s249_s20, 64, %s1163_s25, [#allocation6]  }
  0x21   : > { %s278_s14 = sshll.u32 %s1541_s5, 4  ;;  %p44_p12 = scmp.ge.s32.totalorder %s42_s19, 2  ;;  %s279_s14 = int_to_ptr.vmem [resolvable:$true] %s278_s14 }
  0x22   : > { %856 = dma.vmem_to_smem (!%p851_p11), %s259_s23, 64, %s1164_s15, [#allocation7]  }
  0x23   : > { %862 = dma.vmem_to_smem (!%p851_p11), %s279_s14, 16, %s1165_s18, [#allocation13]  }
  0x24   : > { %p58_p13 = scmp.ne.s32.totalorder %s1148_s28, %s1144_s27  ;;  %p59_p0 = scmp.eq.s32.totalorder %s1160_s6, 0 }
  0x25   : > { %p878_p3 = scmp.lt.s32.totalorder %s1160_s6, 2  ;;  %s1554_s19 = smov (%p44_p12, %s42_s19), 0 }
  0x26   : > { %1542 = sst [smem:[#allocation23_spill]] %s1554_s19  ;;  %p1296_p5 = por %p59_p0, %p58_p13 }
  0x27   : > { %p1302_p7 = por %p1251_p2, %p58_p13  ;;  %s46_s22 = ssub.s32 %s1156_s30, %s1554_s19 }
  0x28   : > { %s292_s23 = sand.u32 1, %s1148_s28   ;;  %p49_p10 = scmp.eq.s32.totalorder %s46_s22, 0 }
  0x29   : > { %s770_s24 = sshll.u32 %s292_s23, 3  ;;  %s825_s25 = sshll.u32 %s1156_s30, 3 }
  0x2a   : > { %s1311_s8 = scalar_select %p49_p10, %s1148_s28, %s51_s21  }
  0x2b   : > { %s302_s15 = scalar_lea.hbm %s1518_s0, %s825_s25  ;;  %s296_s2 = scalar_lea.vmem [#allocation3], %s770_s24 }
  0x2c   : > { %1545 = sst [smem:[#allocation24_spill]] %s1311_s8  ;;  %s303_s18 = sshll.u32 %s302_s15, 4  ;;  %s304_s18 = int_to_ptr.hbm [resolvable:$true] %s303_s18 }
  0x2d   : > { %s305_s3 = sshll.u32 %s296_s2, 4  ;;  %p864_p2 = pnand %p878_p3, %p1296_p5  ;;  %s306_s3 = int_to_ptr.vmem [resolvable:$true] %s305_s3 }
  0x2e   : > { %s293_s11 = scalar_lea.sflag [#allocation4], %s292_s23  ;;  %s1166_s4 = smov 32  }
  0x2f   : > { %s1167_s5 = smov 2   ;;  %s325_s21 = scalar_lea.hbm %s1519_s1, %s825_s25 }
  0x30   : > { %866 = dma.hbm_to_vmem [thread:$0]  (!%p864_p2), %s304_s18, 128, %s306_s3, %s293_s11, %s1166_s4, %s1166_s4, %s1167_s5  }
  0x31   : > { %s319_s30 = scalar_lea.vmem [#allocation8], %s770_s24  ;;  %s326_s9 = sshll.u32 %s325_s21, 4  ;;  %s327_s9 = int_to_ptr.hbm [resolvable:$true] %s326_s9 }
  0x32   : > { %s328_s8 = sshll.u32 %s319_s30, 4  ;;  %s316_s14 = scalar_lea.sflag [#allocation9], %s292_s23  ;;  %s329_s8 = int_to_ptr.vmem [resolvable:$true] %s328_s8 }
  0x33   : > { %869 = dma.hbm_to_vmem [thread:$0]  (!%p864_p2), %s327_s9, 128, %s329_s8, %s316_s14, %s1166_s4, %s1166_s4, %s1167_s5  }
  0x34   : > { %340 = sbr.rel (%p1270_p8) target bundleno = 153 (0x99), region = 48  ;;  %s1326_s2 = sand.u32 (!%p1270_p8), 1, %s1144_s27  }
  0x35   : > { %s1329_s3 = sshll.u32 (!%p1270_p8), %s1326_s2, 3  ;;  %s343_s19 = scalar_lea.sflag (!%p1270_p8), [#allocation4], %s1326_s2 }
  0x36   : > { %s1333_s16 = scalar_lea.vmem (!%p1270_p8), [#allocation3], %s1329_s3 }
  0x39   : > { %1115 = dma.done.wait (%p1257_p4), %s343_s19, 128  }
  0x3a   : > { %1117 = vsyncadd (%p1257_p4), %s343_s19, 4294967168  ;;  %s353_s4 = scalar_lea.sflag [#allocation9], %s1326_s2  ;;  %s1341_s5 = scalar_lea.vmem [#allocation8], %s1329_s3 }
  0x3b   : > { %1119 = dma.done.wait (%p1257_p4), %s353_s4, 128  }
  0x3c   : > { %1121 = vsyncadd (%p1257_p4), %s353_s4, 4294967168 }
  0x3d   : > { %1123 = dma.done.wait (%p1247_p1), [#allocation6], 64  }
  0x3e   : > { %1125 = vsyncadd (%p1247_p1), [#allocation6], 4294967232 }
  0x3f   : > { %1127 = dma.done.wait (%p1247_p1), [#allocation7], 64  }
  0x40   : > { %1129 = vsyncadd (%p1247_p1), [#allocation7], 4294967232 }
  0x41   : > { %1131 = dma.done.wait (%p1247_p1), [#allocation13], 32  }
  0x42   : > { %1133 = vsyncadd (%p1247_p1), [#allocation13], 4294967264 }
  0x43   : > { %382 = sfence }
  0x44   : > { %s422_s30 = sld [smem:[#allocation10]]  ;;  %v1360_v0 = vld [vmem:[%s1341_s5] sm:$0x3]  ;;  %v1363_v1 = vld [vmem:[%s1341_s5 + $0x2] sm:$0x3] }
  0x45   : > { %s784_s12 = sld [smem:[#allocation10 + $0x1]]  ;;  %v1373_v5 = vld [vmem:[%s1341_s5 + $0x4] sm:$0x3]  ;;  %v1382_v10 = vld [vmem:[%s1341_s5 + $0x6] sm:$0x3] }
  0x46   : > { %s785_s17 = sld [smem:[#allocation10 + $0x2]]  ;;  %v1388_v14 = vld [vmem:[%s1333_s16] sm:$0x3]  ;;  %v1404_v25 = vld [vmem:[%s1333_s16 + $0x2] sm:$0x3] }
  0x47   : > { %s786_s23 = sld [smem:[#allocation10 + $0x3]]  ;;  %v1411_v33 = vld [vmem:[%s1333_s16 + $0x4] sm:$0x3]  ;;  %v1429_v47 = vld [vmem:[%s1333_s16 + $0x6] sm:$0x3] }
  0x48   : > { %s1365_s24 = sld [smem:[#allocation11]] }
  0x49   : > { %s1367_s25 = sld [smem:[#allocation11 + $0x1]] }
  0x4a   : > { %v423_v2 = vstv %s422_s30  ;;  %s1370_s10 = sld [smem:[#allocation11 + $0x2]] }
  0x4b   : > { %v424_v3 = vmul.f32 %v423_v2, %v1360_v0  ;;  %v426_v4 = vstv %s784_s12  ;;  %s1376_s8 = sld [smem:[#allocation11 + $0x3]] }
  0x4c   : > { %v427_v6 = vmul.f32 %v426_v4, %v1363_v1  ;;  %v430_v7 = vstv %s785_s17  ;;  %s1378_s15 = sld [smem:[#allocation14]] }
  0x4d   : > { %s790_s18 = sld [smem:[#allocation10 + $0x80]]  ;;  %v431_v9 = vmul.f32 %v430_v7, %v1373_v5  ;;  %v434_v11 = vstv %s786_s23 }
  0x4e   : > { %v428_v8 = vadd.f32 %v427_v6, %v424_v3  ;;  %s791_s11 = sld [smem:[#allocation10 + $0x81]]  ;;  %v435_v13 = vmul.f32 %v434_v11, %v1382_v10  ;;  %v438_v15 = vstv %s1365_s24 }
  0x4f   : > { %s792_s22 = sld [smem:[#allocation10 + $0x82]]  ;;  %v439_v22 = vmul.f32 %v438_v15, %v1388_v14  ;;  %v442_v26 = vstv %s1367_s25 }
  0x50   : > { %s793_s21 = sld [smem:[#allocation10 + $0x83]]  ;;  %v432_v12 = vadd.f32 %v431_v9, %v428_v8  ;;  %v443_v35 = vmul.f32 %v442_v26, %v1404_v25  ;;  %v446_v36 = vstv %s1370_s10 }
  0x51   : > { %s794_s9 = sld [smem:[#allocation11 + $0x80]]  ;;  %v447_v40 = vmul.f32 %v446_v36, %v1411_v33  ;;  %v450_v44 = vstv %s1376_s8 }
  0x52   : > { %s1385_s14 = sld [smem:[#allocation11 + $0x81]]  ;;  %v436_v21 = vadd.f32 %v435_v13, %v432_v12  ;;  %v451_v59 = vmul.f32 %v450_v44, %v1429_v47  ;;  %v454_v8 = vstv %s1378_s15 }
  0x53   : > { %s1391_s19 = sld [smem:[#allocation12]]  ;;  %v461_v16 = vstv %s790_s18 }
  0x54   : > { %v462_v17 = vmul.f32 %v461_v16, %v1360_v0  ;;  %v464_v18 = vstv %s791_s11  ;;  %s1394_s4 = sld [smem:[#allocation11 + $0x82]]  ;;  %v440_v34 = vadd.f32 %v439_v22, %v436_v21 }
  0x55   : > { %v465_v19 = vmul.f32 %v464_v18, %v1363_v1  ;;  %v468_v20 = vstv %s792_s22  ;;  %s1397_s5 = sld [smem:[#allocation11 + $0x83]] }
  0x56   : > { %v469_v23 = vmul.f32 %v468_v20, %v1373_v5  ;;  %v472_v24 = vstv %s793_s21  ;;  %s1401_s30 = sld [smem:[#allocation14 + $0x1]]  ;;  %v444_v43 = vadd.f32 %v443_v35, %v440_v34 }
  0x57   : > { %v466_v27 = vadd.f32 %v465_v19, %v462_v17  ;;  %v473_v28 = vmul.f32 %v472_v24, %v1382_v10  ;;  %v476_v29 = vstv %s794_s9  ;;  %s800_s12 = sld [smem:[#allocation10 + $0x100]] }
  0x58   : > { %v480_v30 = vstv %s1385_s14  ;;  %s801_s17 = sld [smem:[#allocation10 + $0x101]]  ;;  %v477_v32 = vmul.f32 %v476_v29, %v1388_v14  ;;  %v448_v58 = vadd.f32 %v447_v40, %v444_v43 }
  0x59   : > { %v470_v31 = vadd.f32 %v469_v23, %v466_v27  ;;  %s802_s23 = sld [smem:[#allocation10 + $0x102]]  ;;  %v481_v38 = vmul.f32 %v480_v30, %v1404_v25 }
  0x5a   : > { %s803_s24 = sld [smem:[#allocation10 + $0x103]]  ;;  %v484_v39 = vstv %s1394_s4  ;;  %v452_v7 = vadd.f32 %v451_v59, %v448_v58 }
  0x5b   : > { %v474_v37 = vadd.f32 %v473_v28, %v470_v31  ;;  %s1416_s25 = sld [smem:[#allocation11 + $0x100]]  ;;  %v485_v49 = vmul.f32 %v484_v39, %v1411_v33  ;;  %v488_v52 = vstv %s1397_s5 }
  0x5c   : > { %s1419_s18 = sld [smem:[#allocation11 + $0x101]]  ;;  %v489_v62 = vmul.f32 %v488_v52, %v1429_v47  ;;  %v492_v16 = vstv %s1401_s30  ;;  %v455_v23 = vadd.f32 %v454_v8, %v452_v7 }
  0x5d   : > { %v478_v41 = vadd.f32 %v477_v32, %v474_v37  ;;  %v500_v42 = vstv %s800_s12  ;;  %s1422_s11 = sld [smem:[#allocation11 + $0x102]]  ;;  %v458_v37 = vstv %s1391_s19 }
  0x5e   : > { %v501_v45 = vmul.f32 %v500_v42, %v1360_v0  ;;  %v503_v46 = vstv %s801_s17  ;;  %s1426_s10 = sld [smem:[#allocation11 + $0x103]]  ;;  %v456_v36 = vmax.f32 %v455_v23, 0.0 }
  0x5f   : > { %v482_v48 = vadd.f32 %v481_v38, %v478_v41  ;;  %s1432_s22 = sld [smem:[#allocation12 + $0x1]]  ;;  %v504_v50 = vmul.f32 %v503_v46, %v1363_v1  ;;  %v507_v51 = vstv %s802_s23 }
  0x60   : > { %v508_v53 = vmul.f32 %v507_v51, %v1373_v5  ;;  %v511_v54 = vstv %s803_s24  ;;  %s1437_s8 = sld [smem:[#allocation14 + $0x2]]  ;;  %s827_s24 = sshll.u32 %s1152_s29, 3 }
  0x61   : > { %v505_v55 = vadd.f32 %v504_v50, %v501_v45  ;;  %v512_v56 = vmul.f32 %v511_v54, %v1382_v10  ;;  %v515_v57 = vstv %s1416_s25  ;;  %s810_s16 = sld [smem:[#allocation10 + $0x180]]  ;;  %v486_v61 = vadd.f32 %v485_v49, %v482_v48  ;;  %s593_s29 = scalar_lea.sflag [#allocation5], %s1326_s2 }
  0x62   : > { %v519_v60 = vstv %s1419_s18  ;;  %s811_s21 = sld [smem:[#allocation10 + $0x181]]  ;;  %v516_v2 = vmul.f32 %v515_v57, %v1388_v14  ;;  %v459_v45 = vmul.f32 %v458_v37, %v456_v36 }
  0x63   : > { %v509_v63 = vadd.f32 %v508_v53, %v505_v55  ;;  %s812_s9 = sld [smem:[#allocation10 + $0x182]]  ;;  %v523_v3 = vstv %s1422_s11  ;;  %v520_v6 = vmul.f32 %v519_v60, %v1404_v25  ;;  %v490_v11 = vadd.f32 %v489_v62, %v486_v61  ;;  %s605_s11 = scalar_lea.hbm %s1525_s7, %s827_s24 }
  0x64   : > { %s813_s14 = sld [smem:[#allocation10 + $0x183]]  ;;  %v527_v9 = vstv %s1426_s10  ;;  %v524_v13 = vmul.f32 %v523_v3, %v1411_v33  ;;  %s413_s10 = scalar_lea.vmem [#allocation15], %s1329_s3 }
  0x65   : > { %v513_v4 = vadd.f32 %v512_v56, %v509_v63  ;;  %s1447_s4 = sld [smem:[#allocation11 + $0x180]]  ;;  %v528_v20 = vmul.f32 %v527_v9, %v1429_v47  ;;  %v493_v27 = vadd.f32 %v492_v16, %v490_v11 }
  0x66   : > { %s1451_s5 = sld [smem:[#allocation11 + $0x181]]  ;;  %v531_v30 = vstv %s1437_s8  ;;  %s608_s8 = sshll.u32 %s605_s11, 4  ;;  %s609_s8 = int_to_ptr.hbm [resolvable:$true] %s608_s8 }
  0x67   : > { %v517_v12 = vadd.f32 %v516_v2, %v513_v4  ;;  %v539_v15 = vstv %s810_s16  ;;  %s1454_s12 = sld [smem:[#allocation11 + $0x182]]  ;;  %s1076_s16 = sshra.s32 %s609_s8, 4  ;;  %s1077_s16 = int_to_ptr.hbm [resolvable:$true] %s1076_s16 }
  0x68   : > { %v540_v17 = vmul.f32 %v539_v15, %v1360_v0  ;;  %v542_v18 = vstv %s811_s21  ;;  %s1458_s17 = sld [smem:[#allocation11 + $0x183]]  ;;  %s1078_s3 = scalar_lea.hbm %s1077_s16, 8 }
  0x69   : > { %v521_v19 = vadd.f32 %v520_v6, %v517_v12  ;;  %v543_v21 = vmul.f32 %v542_v18, %v1363_v1  ;;  %v546_v22 = vstv %s812_s9  ;;  %s809_s15 = sld [smem:[#allocation12 + $0x2]]  ;;  %p1079_p1 = scmp.ne.s32.totalorder %s1077_s16, %s1078_s3 }
  0x6a   : > { %v547_v24 = vmul.f32 %v546_v22, %v1373_v5  ;;  %v550_v26 = vstv %s813_s14  ;;  %s818_s30 = sld [smem:[#allocation14 + $0x3]]  ;;  %v494_v5 = vmax.f32 %v493_v27, 0.0  ;;  %s1082_s14 = scalar_lea.hbm %s1525_s7, 16 }
  0x6b   : > { %v525_v28 = vadd.f32 %v524_v13, %v521_v19  ;;  %v544_v0 = vadd.f32 %v543_v21, %v540_v17  ;;  %v551_v29 = vmul.f32 %v550_v26, %v1382_v10  ;;  %v554_v31 = vstv %s1447_s4  ;;  %s819_s23 = sld [smem:[#allocation12 + $0x3]]  ;;  %p1080_p4 = pnand %p1079_p1, %p1302_p7 }
  0x6c   : > { %v558_v32 = vstv %s1451_s5  ;;  %v555_v35 = vmul.f32 %v554_v31, %v1388_v14  ;;  %v496_v10 = vstv %s1432_s22  ;;  %s577_s19 = sld [smem:[#allocation2]]  ;;  %s606_s22 = sshll.u32 %s413_s10, 4  ;;  %s607_s22 = int_to_ptr.vmem [resolvable:$true] %s606_s22 }
  0x6d   : > { %v529_v34 = vadd.f32 %v528_v20, %v525_v28  ;;  %v548_v1 = vadd.f32 %v547_v24, %v544_v0  ;;  %v562_v38 = vstv %s1454_s12  ;;  %v559_v41 = vmul.f32 %v558_v32, %v1404_v25  ;;  %p1081_p8 = pneg %p1080_p4  ;;  %p1083_p11 = scmp.lt.s32.totalorder %s1077_s16, %s1525_s7 }
  0x6e   : > { %v566_v42 = vstv %s1458_s17  ;;  %v563_v44 = vmul.f32 %v562_v38, %v1411_v33  ;;  %v497_v46 = vmul.f32 %v496_v10, %v494_v5  ;;  %p1084_p12 = scmp.lt.s32.totalorder %s1082_s14, %s1078_s3 }
  0x6f   : > { %v532_v39 = vadd.f32 %v531_v30, %v529_v34  ;;  %v552_v40 = vadd.f32 %v551_v29, %v548_v1  ;;  %v567_v50 = vmul.f32 %v566_v42, %v1429_v47  ;;  %v535_v51 = vstv %s809_s15 }
  0x70   : > { %v570_v53 = vstv %s818_s30  ;;  %v498_v54 = vadd.f32 %v497_v46, %v459_v45  ;;  %p1085_p13 = por %p1084_p12, %p1083_p11 }
  0x71   : > { %v556_v43 = vadd.f32 %v555_v35, %v552_v40  ;;  %v533_v48 = vmax.f32 %v532_v39, 0.0  ;;  %v574_v58 = vstv %s819_s23 }
  0x72   : > { %v578_v62 = vstv %s577_s19  ;;  %p1086_p0 = pnand %p1085_p13, %p1081_p8 }
  0x73   : > { %v560_v49 = vadd.f32 %v559_v41, %v556_v43  ;;  %v536_v55 = vmul.f32 %v535_v51, %v533_v48 }
  0x75   : > { %v564_v52 = vadd.f32 %v563_v44, %v560_v49  ;;  %v537_v59 = vadd.f32 %v536_v55, %v498_v54 }
  0x77   : > { %v568_v56 = vadd.f32 %v567_v50, %v564_v52 }
  0x79   : > { %v571_v57 = vadd.f32 %v570_v53, %v568_v56 }
  0x7b   : > { %v572_v60 = vmax.f32 %v571_v57, 0.0 }
  0x7d   : > { %v575_v61 = vmul.f32 %v574_v58, %v572_v60 }
  0x7f   : > { %v576_v63 = vadd.f32 %v575_v61, %v537_v59 }
  0x81   : > { %v579_v2 = vadd.f32 %v578_v62, %v576_v63 }
  0x83   : > { %v580_v3 = vmul.f32 0.5, %v579_v2 }
  0x85   : > { %940 = vtanh.f32 %v580_v3 }
  0x8b   : > { %v941_v4 = vpop.eup %940 }
  0x8c   : > { %v582_v6 = vmul.f32 0.5, %v941_v4 }
  0x8e   : > { %v583_v7 = vadd.f32 0.5, %v582_v6 }
  0x90   : > { %v584_v8 = vmul.f32 %v583_v7, %v1388_v14  ;;  %v585_v9 = vmul.f32 %v583_v7, %v1404_v25  ;;  %v586_v11 = vmul.f32 %v583_v7, %v1411_v33  ;;  %v587_v12 = vmul.f32 %v583_v7, %v1429_v47 }
  0x92   : > { %588 = vst [vmem:[%s413_s10] sm:$0x3] %v584_v8 }
  0x93   : > { %589 = vst [vmem:[%s413_s10 + $0x2] sm:$0x3] %v585_v9 }
  0x94   : > { %590 = vst [vmem:[%s413_s10 + $0x4] sm:$0x3] %v586_v11 }
  0x95   : > { %591 = vst [vmem:[%s413_s10 + $0x6] sm:$0x3] %v587_v12 }
  0x96   : > { %1089 = shalt.err (!%p1086_p0)
}
  0x97   : > { %s1168_s2 = smov 32   ;;  %s1169_s12 = smov 2  }
  0x98   : > { %848 = dma.vmem_to_hbm [thread:$0]  (%p1302_p7), %s607_s22, 128, %s609_s8, %s593_s29, %s1168_s2, %s1168_s2, %s1169_s12  }
  0x99 PF: > { %s623_s17 = sand.u32 1, %s1140_s26   ;;  %p871_p3 = pnand %p769_p9, %p1262_p6 }
  0x9a   : > { %s624_s15 = scalar_lea.sflag [#allocation5], %s623_s17 }
  0x9b   : > { %p872_p5 = pneg %p871_p3 }
  0x9d   : > { %1135 = dma.done.wait (%p872_p5), %s624_s15, 128  }
  0x9e   : > { %1137 = vsyncadd (%p872_p5), %s624_s15, 4294967168  ;;  %s30_s6 = sadd.s32 1, %s1160_s6   ;;  %s1546_s30 = sld [smem:[#allocation24_spill]] }
  0x9f   : > { %p27_p10 = scmp.ge.s32.totalorder %s30_s6, 4   ;;  %s1547_s29 = sld [smem:[#allocation22_spill]] }
  0xa0   : > { %s1548_s20 = sld [smem:[#allocation23_spill]]  ;;  %s1549_s26 = smov %s1144_s27 }
  0xa1   : > { %s1550_s27 = smov %s1148_s28 }
  0xa2   :  { %29 = sbr.rel (!%p27_p10) target bundleno = 17 (0x11), region = 124 }
  0xa4   : > { %s1551_s28 = smov %s1546_s30 }
  0xa6   : > { %s1552_s30 = smov %s1548_s20 }
  0xa7   :  { %630 = vsyncpa [#allocation4], 1 }
  0xa8   :  { %632 = vsyncpa [#allocation4 + $0x1], 1 }
  0xa9   :  { %633 = vsyncpa [#allocation9], 1 }
  0xaa   :  { %635 = vsyncpa [#allocation9 + $0x1], 1 }
  0xab   :  { %636 = vsyncpa [#allocation5], 1 }
  0xac   :  { %638 = vsyncpa [#allocation5 + $0x1], 1 }
  0xad   :  { %639 = vsyncpa [#allocation6], 1 }
  0xae   :  { %641 = vsyncpa [#allocation6 + $0x1], 1 }
  0xaf   :  { %642 = vsyncpa [#allocation7], 1 }
  0xb0   :  { %644 = vsyncpa [#allocation7 + $0x1], 1 }
  0xb1   :  { %645 = vsyncpa [#allocation13], 1 }

</bundles_post_ra>
